<compile_context>
chip_gen: v6e
topology: v6e:2x2x1
jax: 0.10.0
libtpu: 0.0.40
codegen_flags: <defaults>
</compile_context>

<pallas_src>
import jax
import jax.numpy as jnp
from jax.experimental import pallas as pl
from jax.experimental.pallas import tpu as pltpu


def soft_loss_kernel(pred_ref, lab_ref, y_ref, num_ref, den_ref,
                     num_acc, den_acc):
    i = pl.program_id(1)

    # Reset per-batch-element accumulators on the first voxel tile.
    @pl.when(i == 0)
    def _():
        num_acc[...] = jnp.zeros_like(num_acc)
        den_acc[...] = jnp.zeros_like(den_acc)

    pred = pred_ref[...].astype(jnp.float32)        # (C, tl)
    lab = lab_ref[...].astype(jnp.float32)          # (C, tl)
    ty = (y_ref[...] == 0).astype(jnp.float32)      # (1, tl)  background mask

    # softmax(lab_logits) over classes (sublane axis), kept unnormalized:
    #   softmax = lab_e / z_lab
    lab_max = jnp.max(lab, axis=0, keepdims=True)            # (1, tl)
    lab_e = jnp.exp(lab - lab_max)                           # (C, tl)
    z_lab = jnp.sum(lab_e, axis=0, keepdims=True)            # (1, tl)

    # log_softmax(pred_logits) over classes
    pred_max = jnp.max(pred, axis=0, keepdims=True)          # (1, tl)
    pred_sh = pred - pred_max                                # (C, tl)
    z_pred = jnp.sum(jnp.exp(pred_sh), axis=0, keepdims=True)
    pred_lsm = pred_sh - jnp.log(z_pred)                     # (C, tl)

    # Reduce over C first (cheap sublane reduce), then a single
    # normalization + mask multiply per voxel.
    t = jnp.sum(lab_e * pred_lsm, axis=0, keepdims=True)     # (1, tl)
    num_acc[...] += (t / z_lab) * ty
    den_acc[...] += ty

    # Finalize once per batch element: single cross-lane reduce, broadcast
    # the scalar partials into the (1, 8, 128) output blocks.
    @pl.when(i == pl.num_programs(1) - 1)
    def _():
        num_ref[...] = jnp.zeros_like(num_ref) + jnp.sum(num_acc[...])
        den_ref[...] = jnp.zeros_like(den_ref) + jnp.sum(den_acc[...])


def soft_loss(pred_logits, lab_logits, y, *, tl=4096):
    """pred_logits, lab_logits: (N, C, H, W, D) float; y: (N, 1, H, W, D) int."""
    N, C, H, W, D = pred_logits.shape
    L = H * W * D

    # Free reshapes only -- no HBM transpose pass.
    pred3d = pred_logits.reshape(N, C, L)
    lab3d = lab_logits.reshape(N, C, L)
    y3d = y.reshape(N, 1, L).astype(jnp.int32)

    # Lane-dense voxel tile: multiple of 128, capped at (padded) L.
    l128 = ((L + 127) // 128) * 128
    tl = max(128, min((tl // 128) * 128, l128))
    l_pad = ((L + tl - 1) // tl) * tl
    if l_pad != L:
        pad = l_pad - L
        pred3d = jnp.pad(pred3d, ((0, 0), (0, 0), (0, pad)))
        lab3d = jnp.pad(lab3d, ((0, 0), (0, 0), (0, pad)))
        # Pad labels with a nonzero class so padded voxels have mask Ty == 0.
        y3d = jnp.pad(y3d, ((0, 0), (0, 0), (0, pad)), constant_values=1)

    grid = (N, l_pad // tl)

    num_part, den_part = pl.pallas_call(
        soft_loss_kernel,
        out_shape=(
            jax.ShapeDtypeStruct((N, 8, 128), jnp.float32),
            jax.ShapeDtypeStruct((N, 8, 128), jnp.float32),
        ),
        grid_spec=pltpu.PrefetchScalarGridSpec(
            num_scalar_prefetch=0,
            grid=grid,
            in_specs=[
                pl.BlockSpec((None, C, tl), lambda n, i: (n, 0, i)),  # pred
                pl.BlockSpec((None, C, tl), lambda n, i: (n, 0, i)),  # lab
                pl.BlockSpec((None, 1, tl), lambda n, i: (n, 0, i)),  # y
            ],
            out_specs=[
                pl.BlockSpec((1, 8, 128), lambda n, i: (n, 0, 0)),    # num partial
                pl.BlockSpec((1, 8, 128), lambda n, i: (n, 0, 0)),    # den partial
            ],
            scratch_shapes=[
                pltpu.VMEM((1, tl), jnp.float32),  # numerator accumulator
                pltpu.VMEM((1, tl), jnp.float32),  # mask-count accumulator
            ],
        ),
        compiler_params=pltpu.CompilerParams(
            # batch axis parallel (uses both TCs on v7x), voxel reduce arbitrary
            dimension_semantics=("parallel", "arbitrary"),
        ),
    )(pred3d, lab3d, y3d)

    # Combine the per-batch-element partials (tiny reduction in plain JAX).
    num_tot = jnp.sum(num_part[:, 0, 0])
    den_tot = jnp.sum(den_part[:, 0, 0])
    # TODO(synk): den_tot == 0 (no background voxel) yields NaN/Inf exactly
    # like the PyTorch reference; add a guard here if that case is reachable.
    return -num_tot / den_tot


def soft_loss_ref(pred_logits, lab_logits, y):
    """Pure-JAX reference mirroring the PyTorch forward exactly."""
    Ty = (y == 0).astype(jnp.float32)  # (N,1,H,W,D), broadcasts over C
    lab_sm = jax.nn.softmax(lab_logits, axis=1)
    pred_lsm = jax.nn.log_softmax(pred_logits, axis=1)
    return -jnp.sum(lab_sm * pred_lsm * Ty) / jnp.sum(Ty)


if __name__ == "__main__":
    key = jax.random.PRNGKey(0)
    k1, k2, k3 = jax.random.split(key, 3)

    N, C, H, W, D = 2, 4, 8, 8, 8  # num_classes = 4
    pred_logits = jax.random.normal(k1, (N, C, H, W, D), dtype=jnp.float32)
    lab_logits = jax.random.normal(k2, (N, C, H, W, D), dtype=jnp.float32)
    # labels in {0, ..., C-1}; Ty selects voxels where y == 0
    y = jax.random.randint(k3, (N, 1, H, W, D), 0, C, dtype=jnp.int32)

    loss = jax.block_until_ready(soft_loss(pred_logits, lab_logits, y))
    ref = jax.block_until_ready(soft_loss_ref(pred_logits, lab_logits, y))

    assert jnp.allclose(loss, ref, rtol=1e-5, atol=1e-5), (loss, ref)
    print("KERNEL_OK")
</pallas_src>

<mosaic_0001>
module attributes {stable_mosaic.version = 11 : i64} {
  func.func @soft_loss_kernel(%arg0: i32, %arg1: i32, %arg2: memref<1x4x512xf32, #tpu.memory_space<vmem>>, %arg3: memref<1x4x512xf32, #tpu.memory_space<vmem>>, %arg4: memref<1x1x512xi32, #tpu.memory_space<vmem>>, %arg5: memref<1x8x128xf32, #tpu.memory_space<vmem>>, %arg6: memref<1x8x128xf32, #tpu.memory_space<vmem>>, %arg7: memref<1x512xf32, #tpu.memory_space<vmem>>, %arg8: memref<1x512xf32, #tpu.memory_space<vmem>>) attributes {dimension_semantics = [#tpu.dimension_semantics<parallel>, #tpu.dimension_semantics<arbitrary>], iteration_bounds = array<i64: 2, 1>, scalar_prefetch = 0 : i64, scratch_operands = 2 : i64, tpu.core_type = #tpu.core_type<tc>, window_params = [{transform_indices = @transform_0, window_bounds = array<i64: 1, 4, 512>}, {transform_indices = @transform_1, window_bounds = array<i64: 1, 4, 512>}, {transform_indices = @transform_2, window_bounds = array<i64: 1, 1, 512>}, {transform_indices = @transform_3, window_bounds = array<i64: 1, 8, 128>}, {transform_indices = @transform_4, window_bounds = array<i64: 1, 8, 128>}]} {
    %c0_i32 = arith.constant 0 : i32
    %0 = arith.cmpi eq, %arg1, %c0_i32 : i32
    %1 = arith.extui %0 : i1 to i32
    %c0_i32_0 = arith.constant 0 : i32
    %2 = arith.cmpi ne, %1, %c0_i32_0 : i32
    scf.if %2 {
      %cst_24 = arith.constant 0.000000e+00 : f32
      %44 = vector.broadcast %cst_24 : f32 to vector<1x512xf32>
      %c0_25 = arith.constant 0 : index
      %c0_26 = arith.constant 0 : index
      %45 = vector.load %arg7[%c0_25, %c0_26] : memref<1x512xf32, #tpu.memory_space<vmem>>, vector<1x512xf32>
      tpu.vector_store %arg7[%c0_25, %c0_26], %44 {strides = array<i32>} : memref<1x512xf32, #tpu.memory_space<vmem>>, vector<1x512xf32>,
      %cst_27 = arith.constant 0.000000e+00 : f32
      %46 = vector.broadcast %cst_27 : f32 to vector<1x512xf32>
      %c0_28 = arith.constant 0 : index
      %c0_29 = arith.constant 0 : index
      %47 = vector.load %arg8[%c0_28, %c0_29] : memref<1x512xf32, #tpu.memory_space<vmem>>, vector<1x512xf32>
      tpu.vector_store %arg8[%c0_28, %c0_29], %46 {strides = array<i32>} : memref<1x512xf32, #tpu.memory_space<vmem>>, vector<1x512xf32>,
    } else {
    }
    %c0 = arith.constant 0 : index
    %c0_1 = arith.constant 0 : index
    %c0_2 = arith.constant 0 : index
    %3 = vector.load %arg2[%c0, %c0_1, %c0_2] : memref<1x4x512xf32, #tpu.memory_space<vmem>>, vector<1x4x512xf32>
    %4 = vector.shape_cast %3 : vector<1x4x512xf32> to vector<4x512xf32>
    %c0_3 = arith.constant 0 : index
    %c0_4 = arith.constant 0 : index
    %c0_5 = arith.constant 0 : index
    %5 = vector.load %arg3[%c0_3, %c0_4, %c0_5] : memref<1x4x512xf32, #tpu.memory_space<vmem>>, vector<1x4x512xf32>
    %6 = vector.shape_cast %5 : vector<1x4x512xf32> to vector<4x512xf32>
    %c0_6 = arith.constant 0 : index
    %c0_7 = arith.constant 0 : index
    %c0_8 = arith.constant 0 : index
    %7 = vector.load %arg4[%c0_6, %c0_7, %c0_8] : memref<1x1x512xi32, #tpu.memory_space<vmem>>, vector<1x1x512xi32>
    %8 = vector.shape_cast %7 : vector<1x1x512xi32> to vector<1x512xi32>
    %c0_i32_9 = arith.constant 0 : i32
    %9 = vector.broadcast %c0_i32_9 : i32 to vector<1x512xi32>
    %10 = arith.cmpi eq, %8, %9 : vector<1x512xi32>
    %11 = arith.extui %10 : vector<1x512xi1> to vector<1x512xi32>
    %12 = arith.sitofp %11 : vector<1x512xi32> to vector<1x512xf32>
    %cst = arith.constant dense<0xFF800000> : vector<512xf32>
    %13 = vector.multi_reduction <maximumf>, %6, %cst [0] : vector<4x512xf32> to vector<512xf32>
    %14 = vector.shape_cast %13 : vector<512xf32> to vector<1x512xf32>
    %15 = vector.broadcast %14 : vector<1x512xf32> to vector<4x512xf32>
    %16 = arith.subf %6, %15 : vector<4x512xf32>
    %17 = math.exp %16 : vector<4x512xf32>
    %cst_10 = arith.constant dense<0.000000e+00> : vector<512xf32>
    %18 = vector.multi_reduction <add>, %17, %cst_10 [0] : vector<4x512xf32> to vector<512xf32>
    %19 = vector.shape_cast %18 : vector<512xf32> to vector<1x512xf32>
    %cst_11 = arith.constant dense<0xFF800000> : vector<512xf32>
    %20 = vector.multi_reduction <maximumf>, %4, %cst_11 [0] : vector<4x512xf32> to vector<512xf32>
    %21 = vector.shape_cast %20 : vector<512xf32> to vector<1x512xf32>
    %22 = vector.broadcast %21 : vector<1x512xf32> to vector<4x512xf32>
    %23 = arith.subf %4, %22 : vector<4x512xf32>
    %24 = math.exp %23 : vector<4x512xf32>
    %cst_12 = arith.constant dense<0.000000e+00> : vector<512xf32>
    %25 = vector.multi_reduction <add>, %24, %cst_12 [0] : vector<4x512xf32> to vector<512xf32>
    %26 = vector.shape_cast %25 : vector<512xf32> to vector<1x512xf32>
    %27 = math.log %26 : vector<1x512xf32>
    %28 = vector.broadcast %27 : vector<1x512xf32> to vector<4x512xf32>
    %29 = arith.subf %23, %28 : vector<4x512xf32>
    %30 = arith.mulf %17, %29 : vector<4x512xf32>
    %cst_13 = arith.constant dense<0.000000e+00> : vector<512xf32>
    %31 = vector.multi_reduction <add>, %30, %cst_13 [0] : vector<4x512xf32> to vector<512xf32>
    %32 = vector.shape_cast %31 : vector<512xf32> to vector<1x512xf32>
    %c0_14 = arith.constant 0 : index
    %c0_15 = arith.constant 0 : index
    %33 = vector.load %arg7[%c0_14, %c0_15] : memref<1x512xf32, #tpu.memory_space<vmem>>, vector<1x512xf32>
    %34 = arith.divf %32, %19 : vector<1x512xf32>
    %35 = arith.mulf %34, %12 : vector<1x512xf32>
    %36 = arith.addf %33, %35 : vector<1x512xf32>
    %c0_16 = arith.constant 0 : index
    %c0_17 = arith.constant 0 : index
    %37 = vector.load %arg7[%c0_16, %c0_17] : memref<1x512xf32, #tpu.memory_space<vmem>>, vector<1x512xf32>
    tpu.vector_store %arg7[%c0_16, %c0_17], %36 {strides = array<i32>} : memref<1x512xf32, #tpu.memory_space<vmem>>, vector<1x512xf32>,
    %c0_18 = arith.constant 0 : index
    %c0_19 = arith.constant 0 : index
    %38 = vector.load %arg8[%c0_18, %c0_19] : memref<1x512xf32, #tpu.memory_space<vmem>>, vector<1x512xf32>
    %39 = arith.addf %38, %12 : vector<1x512xf32>
    %c0_20 = arith.constant 0 : index
    %c0_21 = arith.constant 0 : index
    %40 = vector.load %arg8[%c0_20, %c0_21] : memref<1x512xf32, #tpu.memory_space<vmem>>, vector<1x512xf32>
    tpu.vector_store %arg8[%c0_20, %c0_21], %39 {strides = array<i32>} : memref<1x512xf32, #tpu.memory_space<vmem>>, vector<1x512xf32>,
    %c0_i32_22 = arith.constant 0 : i32
    %41 = arith.cmpi eq, %arg1, %c0_i32_22 : i32
    %42 = arith.extui %41 : i1 to i32
    %c0_i32_23 = arith.constant 0 : i32
    %43 = arith.cmpi ne, %42, %c0_i32_23 : i32
    scf.if %43 {
      %cst_24 = arith.constant 0.000000e+00 : f32
      %44 = vector.broadcast %cst_24 : f32 to vector<1x8x128xf32>
      %c0_25 = arith.constant 0 : index
      %c0_26 = arith.constant 0 : index
      %45 = vector.load %arg7[%c0_25, %c0_26] : memref<1x512xf32, #tpu.memory_space<vmem>>, vector<1x512xf32>
      %46 = vector.shape_cast %45 : vector<1x512xf32> to vector<1x1x512xf32>
      %cst_27 = arith.constant dense<0.000000e+00> : vector<1xf32>
      %47 = vector.multi_reduction <add>, %46, %cst_27 [1, 2] : vector<1x1x512xf32> to vector<1xf32>
      %48 = vector.shape_cast %47 : vector<1xf32> to vector<1x1x1xf32>
      %49 = vector.extract %48[0, 0, 0] : f32 from vector<1x1x1xf32>
      %50 = vector.broadcast %49 : f32 to vector<1x8x128xf32>
      %51 = arith.addf %44, %50 : vector<1x8x128xf32>
      %c0_28 = arith.constant 0 : index
      %c0_29 = arith.constant 0 : index
      %c0_30 = arith.constant 0 : index
      %52 = vector.load %arg5[%c0_28, %c0_29, %c0_30] : memref<1x8x128xf32, #tpu.memory_space<vmem>>, vector<1x8x128xf32>
      tpu.vector_store %arg5[%c0_28, %c0_29, %c0_30], %51 {strides = array<i32>} : memref<1x8x128xf32, #tpu.memory_space<vmem>>, vector<1x8x128xf32>,
      %cst_31 = arith.constant 0.000000e+00 : f32
      %53 = vector.broadcast %cst_31 : f32 to vector<1x8x128xf32>
      %c0_32 = arith.constant 0 : index
      %c0_33 = arith.constant 0 : index
      %54 = vector.load %arg8[%c0_32, %c0_33] : memref<1x512xf32, #tpu.memory_space<vmem>>, vector<1x512xf32>
      %55 = vector.shape_cast %54 : vector<1x512xf32> to vector<1x1x512xf32>
      %cst_34 = arith.constant dense<0.000000e+00> : vector<1xf32>
      %56 = vector.multi_reduction <add>, %55, %cst_34 [1, 2] : vector<1x1x512xf32> to vector<1xf32>
      %57 = vector.shape_cast %56 : vector<1xf32> to vector<1x1x1xf32>
      %58 = vector.extract %57[0, 0, 0] : f32 from vector<1x1x1xf32>
      %59 = vector.broadcast %58 : f32 to vector<1x8x128xf32>
      %60 = arith.addf %53, %59 : vector<1x8x128xf32>
      %c0_35 = arith.constant 0 : index
      %c0_36 = arith.constant 0 : index
      %c0_37 = arith.constant 0 : index
      %61 = vector.load %arg6[%c0_35, %c0_36, %c0_37] : memref<1x8x128xf32, #tpu.memory_space<vmem>>, vector<1x8x128xf32>
      tpu.vector_store %arg6[%c0_35, %c0_36, %c0_37], %60 {strides = array<i32>} : memref<1x8x128xf32, #tpu.memory_space<vmem>>, vector<1x8x128xf32>,
    } else {
    }
    return
  }
  func.func @transform_0(%arg0: i32, %arg1: i32) -> (i32, i32, i32) {
    %c0_i32 = arith.constant 0 : i32
    %c0_i32_0 = arith.constant 0 : i32
    return %arg0, %c0_i32, %arg1 : i32, i32, i32
  }
  func.func @transform_1(%arg0: i32, %arg1: i32) -> (i32, i32, i32) {
    %c0_i32 = arith.constant 0 : i32
    %c0_i32_0 = arith.constant 0 : i32
    return %arg0, %c0_i32, %arg1 : i32, i32, i32
  }
  func.func @transform_2(%arg0: i32, %arg1: i32) -> (i32, i32, i32) {
    %c0_i32 = arith.constant 0 : i32
    %c0_i32_0 = arith.constant 0 : i32
    return %arg0, %c0_i32, %arg1 : i32, i32, i32
  }
  func.func @transform_3(%arg0: i32, %arg1: i32) -> (i32, i32, i32) {
    %c0_i32 = arith.constant 0 : i32
    %c0_i32_0 = arith.constant 0 : i32
    %c0_i32_1 = arith.constant 0 : i32
    return %arg0, %c0_i32, %c0_i32_0 : i32, i32, i32
  }
  func.func @transform_4(%arg0: i32, %arg1: i32) -> (i32, i32, i32) {
    %c0_i32 = arith.constant 0 : i32
    %c0_i32_0 = arith.constant 0 : i32
    %c0_i32_1 = arith.constant 0 : i32
    return %arg0, %c0_i32, %c0_i32_0 : i32, i32, i32
  }
}

</mosaic_0001>

<bundles_post_ra>
// kernel: tpu_custom_call.1
= control target key start
LH: loop header
LB: loop body
LE: loop exit
PB: predicated region body
PF: predicated region fallthrough
CT: control target
= control target key end

     0   :  { %s1639_s0 = inlined_call_operand.hbm [shape: f32[2,4,512], index: 0, kind: input, shape index: {}]   ;;  %s1640_s1 = inlined_call_operand.hbm [shape: f32[2,4,512], index: 1, kind: input, shape index: {}]   ;;  %s1641_s2 = inlined_call_operand.hbm [shape: s32[2,1,512], index: 2, kind: input, shape index: {}]   ;;  %s1642_s3 = inlined_call_operand.hbm [shape: f32[2,8,128], index: 3, kind: output, shape index: {0}]   ;;  %s1643_s4 = inlined_call_operand.hbm [shape: f32[2,8,128], index: 4, kind: output, shape index: {1}]  }
   0x1   :  { %1645 = sst [smem:[#allocation19_spill]] %s1640_s1 }
   0x2   :  { %10 = vsyncpa [#allocation5], 0 }
   0x3   :  { %12 = vsyncpa [#allocation5 + $0x1], 0 }
   0x4   :  { %13 = vsyncpa [#allocation8], 0 }
   0x5   :  { %15 = vsyncpa [#allocation8 + $0x1], 0 }
   0x6   :  { %16 = vsyncpa [#allocation6], 0 }
   0x7   :  { %18 = vsyncpa [#allocation6 + $0x1], 0 }
   0x8   :  { %19 = vsyncpa [#allocation12], 0 }
   0x9   :  { %21 = vsyncpa [#allocation12 + $0x1], 0  ;;  %s1286_s15 = smov 0   ;;  %s1288_s16 = smov 0  }
   0xa   :  { %s1290_s17 = smov 0   ;;  %s1292_s18 = smov 0  }
   0xb   :  { %s1294_s19 = smov 0   ;;  %s1296_s20 = smov 0  }
   0xc LB: > { %s1317_s21 = sadd.s32 4294967295, %s1252_s20   ;;  %s915_s22 = sadd.s32 4294967294, %s1252_s20   ;;  %s1252_s20 = sphi %s1296_s20, %s27_s20   ;;  %s1248_s19 = sphi %s1294_s19, %s1664_s19   ;;  %s1244_s18 = sphi %s1292_s18, %s1663_s18   ;;  %s1240_s17 = sphi %s1290_s17, %s1662_s17   ;;  %s1236_s16 = sphi %s1288_s16, %s1661_s16   ;;  %s1232_s15 = sphi %s1286_s15, %s1660_s15  }
   0xd   : > { %s39_s23 = sadd.s32 1, %s1248_s19  ;;  %s48_s24 = sadd.s32 1, %s1240_s17 }
   0xe   : > { %p41_p0 = scmp.ge.s32.totalorder %s39_s23, 2  ;;  %p55_p1 = scmp.ne.s32.totalorder %s1240_s17, %s1236_s16 }
   0xf   : > { %p56_p2 = scmp.eq.s32.totalorder %s1252_s20, 0  ;;  %p61_p3 = scmp.ne.s32.totalorder %s1236_s16, %s1232_s15 }
  0x10   : > { %s1666_s23 = smov (%p41_p0, %s39_s23), 0  ;;  %p62_p5 = scmp.eq.s32.totalorder %s1317_s21, 0 }
  0x11   : > { %1646 = sst [smem:[#allocation17_spill]] %s1666_s23  ;;  %p1329_p4 = por %p56_p2, %p55_p1 }
  0x12   : > { %s43_s26 = ssub.s32 %s1248_s19, %s1666_s23  ;;  %p141_p6 = scmp.eq.s32.totalorder %s1317_s21, 1 }
  0x13   : > { %p46_p7 = scmp.eq.s32.totalorder %s43_s26, 0  ;;  %p1337_p8 = por %p62_p5, %p61_p3 }
  0x14   : > { %p1341_p9 = por %p141_p6, %p55_p1  ;;  %p147_p10 = scmp.eq.s32.totalorder %s915_s22, 1 }
  0x15   : > { %s1346_s29 = scalar_select %p46_p7, %s1240_s17, %s48_s24  }
  0x16   : > { %p1348_p11 = por %p147_p10, %p61_p3  ;;  %p974_p13 = scmp.lt.s32.totalorder %s1252_s20, 2 }
  0x17   : > { %1650 = sst [smem:[#allocation18_spill]] %s1346_s29  ;;  %s1355_s5 = sand.u32 1, %s1240_s17  }
  0x18   : > { %s918_s6 = sshll.u32 %s1355_s5, 4  ;;  %s940_s7 = sshll.u32 %s1248_s19, 8 }
  0x19   : > { %p1361_p0 = pnand %p974_p13, %p1329_p4  ;;  %s214_s9 = sand.u32 1, %s1252_s20  }
  0x1a   : > { %s1653_s1 = sld [smem:[#allocation19_spill]]  ;;  %s218_s13 = scalar_lea.vmem [#allocation7], %s918_s6 }
  0x1b   : > { %s228_s14 = sshll.u32 %s218_s13, 4  ;;  %p927_p1 = scmp.ge.s32.totalorder %s1252_s20, 1  ;;  %s229_s14 = int_to_ptr.vmem [resolvable:$true] %s228_s14 }
  0x1c   : > { %p254_p2 = scmp.lt.s32.totalorder %s1252_s20, 3  ;;  %s1371_s22 = scalar_lea.sflag [#allocation8], %s214_s9 }
  0x1d   : > { %p1056_p3 = pneg %p1361_p0  ;;  %s1067_s24 = scalar_lea.vmem %s229_s14, 256 }
  0x1e   : > { %p1068_p4 = scmp.ne.s32.totalorder %s229_s14, %s1067_s24  ;;  %s1254_s25 = smov [#allocation7]  }
  0x1f   : > { %s1072_s26 = sshll.u32 %s1254_s25, 4  ;;  %s1073_s26 = int_to_ptr.vmem [resolvable:$false] %s1072_s26 }
  0x20   : > { %s226_s12 = scalar_lea.hbm %s1653_s1, %s940_s7  ;;  %p1070_p5 = pnand %p1068_p4, %p1056_p3 }
  0x21   : > { %s1074_s10 = scalar_lea.vmem %s1073_s26, 512  ;;  %p1075_p7 = scmp.lt.s32.totalorder %s229_s14, %s1073_s26 }
  0x22   : > { %p1071_p6 = pneg %p1070_p5  ;;  %p1076_p10 = scmp.lt.s32.totalorder %s1074_s10, %s1067_s24 }
  0x24   : > { %p1077_p13 = por %p1076_p10, %p1075_p7 }
  0x26   : > { %p1078_p12 = pnand %p1077_p13, %p1071_p6 }
  0x28   : > { %1081 = shalt.err (!%p1078_p12)
}
  0x29   : > { %963 = dma.hbm_to_vmem [thread:$0]  (!%p1361_p0), %s226_s12, 256, %s229_s14, %s1371_s22  }
  0x2a   : > { %p1385_p4 = pnand %p927_p1, %p254_p2  ;;  %s205_s24 = scalar_lea.hbm %s1639_s0, %s940_s7 }
  0x2b   : > { %s197_s25 = scalar_lea.vmem [#allocation4], %s918_s6  ;;  %s924_s10 = sshll.u32 %s1355_s5, 2 }
  0x2c   : > { %s207_s26 = sshll.u32 %s197_s25, 4  ;;  %s194_s1 = scalar_lea.sflag [#allocation5], %s1355_s5  ;;  %s208_s26 = int_to_ptr.vmem [resolvable:$true] %s207_s26 }
  0x2d   : > { %s1095_s23 = scalar_lea.vmem %s208_s26, 256  ;;  %s1255_s12 = smov [#allocation4]  }
  0x2e   : > { %p1096_p12 = scmp.ne.s32.totalorder %s208_s26, %s1095_s23  ;;  %s1100_s14 = sshll.u32 %s1255_s12, 4  ;;  %s1101_s14 = int_to_ptr.vmem [resolvable:$false] %s1100_s14 }
  0x2f   : > { %s1102_s29 = scalar_lea.vmem %s1101_s14, 512  ;;  %p1103_p1 = scmp.lt.s32.totalorder %s208_s26, %s1101_s14 }
  0x30   : > { %p1098_p5 = pnand %p1096_p12, %p1056_p3  ;;  %p1104_p2 = scmp.lt.s32.totalorder %s1102_s29, %s1095_s23 }
  0x32   : > { %p1099_p6 = pneg %p1098_p5  ;;  %p1105_p7 = por %p1104_p2, %p1103_p1 }
  0x34   : > { %p1106_p10 = pnand %p1105_p7, %p1099_p6 }
  0x36   : > { %1109 = shalt.err (!%p1106_p10)
}
  0x37   : > { %960 = dma.hbm_to_vmem [thread:$0]  (!%p1361_p0), %s205_s24, 256, %s208_s26, %s194_s1  }
  0x38   : > { %s942_s5 = sshll.u32 %s1248_s19, 6  ;;  %s239_s6 = scalar_lea.vmem [#allocation9], %s924_s10 }
  0x39   : > { %s249_s7 = sshll.u32 %s239_s6, 4  ;;  %s247_s25 = scalar_lea.hbm %s1641_s2, %s942_s5  ;;  %s250_s7 = int_to_ptr.vmem [resolvable:$true] %s249_s7 }
  0x3a   : > { %s1123_s12 = scalar_lea.vmem %s250_s7, 64  ;;  %s1256_s23 = smov [#allocation9]  }
  0x3b   : > { %p1124_p13 = scmp.ne.s32.totalorder %s250_s7, %s1123_s12  ;;  %s1128_s29 = sshll.u32 %s1256_s23, 4  ;;  %s1129_s29 = int_to_ptr.vmem [resolvable:$false] %s1128_s29 }
  0x3c   : > { %s1130_s14 = scalar_lea.vmem %s1129_s29, 128  ;;  %p1131_p6 = scmp.lt.s32.totalorder %s250_s7, %s1129_s29 }
  0x3d   : > { %p1126_p12 = pnand %p1124_p13, %p1056_p3  ;;  %p1132_p1 = scmp.lt.s32.totalorder %s1130_s14, %s1123_s12 }
  0x3f   : > { %p1127_p5 = pneg %p1126_p12  ;;  %p1133_p2 = por %p1132_p1, %p1131_p6 }
  0x41   : > { %p1134_p7 = pnand %p1133_p2, %p1127_p5 }
  0x43   : > { %1137 = shalt.err (!%p1134_p7)
}
  0x44   : > { %966 = dma.hbm_to_vmem [thread:$0]  (!%p1361_p0), %s247_s25, 64, %s250_s7, %s1371_s22  }
  0x45   : > { %258 = sbr.rel (%p1385_p4) target bundleno = 441 (0x1b9), region = 32  ;;  %s1412_s1 = sand.u32 (!%p1385_p4), 1, %s1236_s16  }
  0x46   : > { %s928_s24 = sshll.u32 (!%p1385_p4), %s1412_s1, 4  ;;  %s261_s26 = scalar_lea.sflag (!%p1385_p4), [#allocation5], %s1412_s1 }
  0x47   : > { %s264_s10 = scalar_lea.vmem (!%p1385_p4), [#allocation4], %s928_s24 }
  0x4a   : > { %1215 = dma.done.wait (%p1337_p8), %s261_s26, 256  }
  0x4b   : > { %1217 = vsyncadd (%p1337_p8), %s261_s26, 4294967040  ;;  %s269_s8 = sand.u32 1, %s1317_s21   ;;  %s273_s9 = scalar_lea.vmem [#allocation7], %s928_s24 }
  0x4c   : > { %s270_s22 = scalar_lea.sflag [#allocation8], %s269_s8 }
  0x4d   : > { %1219 = dma.done.wait (%p1337_p8), %s270_s22, 320  }
  0x4e   : > { %1221 = vsyncadd (%p1337_p8), %s270_s22, 4294966976  ;;  %v329_v0 = vlaneseq  ;;  %s930_s5 = sshll.u32 %s1412_s1, 2  ;;  %v1257_v3 = vmov 0.0   ;;  %vm349_vm1 = vcmask 1043456   ;;  %v1439_v5 = vld [vmem:[%s264_s10] sm:$0xff]  ;;  %v1441_v6 = vld [vmem:[%s264_s10 + $0x8] sm:$0xff] }
  0x4f   : > { %v1443_v7 = vld [vmem:[%s273_s9] sm:$0xff]  ;;  %v1454_v11 = vld [vmem:[%s273_s9 + $0x8] sm:$0xff]  ;;  %s282_s21 = scalar_lea.vmem [#allocation9], %s930_s5  ;;  %v428_v15 = vcombine.high %v1439_v5, %v1439_v5  ;;  %v429_v16 = vcombine.high %v1441_v6, %v1441_v6  ;;  %v432_v23 = vsel %vm349_vm1, %v1439_v5, -inf  ;;  %v446_v31 = vsel %vm349_vm1, %v1441_v6, -inf  ;;  %s931_s27 = sshll.u32 %s1412_s1, 3 }
  0x50   : > { %vm1426_vm0 = vcmp.lt.s32.totalorder %v329_v0, 512  ;;  %v1430_v2 = vshrl.u32 %v329_v0, 7  ;;  %v339_v12 = vld [vmem:[%s282_s21] sm:$0xf]  ;;  %v345_v13 = vcombine.high %v1443_v7, %v1443_v7  ;;  %v350_v14 = vsel %vm349_vm1, %v1443_v7, -inf  ;;  %s936_s6 = sshll.u32 %s1244_s18, 7 }
  0x51   : > { %333 = vst.msk [vmem:[#allocation2] sm:$0xf] %vm1426_vm0, %v1257_v3  ;;  %334 = vst.msk [vmem:[#allocation3] sm:$0xf] %vm1426_vm0, %v1257_v3  ;;  %vm340_vm2 = vcmp.eq.s32.totalorder %v339_v12, 0  ;;  %v346_v17 = vcombine.high %v1454_v11, %v1454_v11  ;;  %v351_v18 = vrot.slane %v350_v14, 4  ;;  %s1566_s29 = scalar_lea.hbm %s1642_s3, %s936_s6 }
  0x52   : > { %v1437_v4 = vsub.s32 0, %v1430_v2  ;;  %v1446_v8 = vsub.s32 1, %v1430_v2  ;;  %v1449_v9 = vsub.s32 2, %v1430_v2  ;;  %v1452_v10 = vsub.s32 3, %v1430_v2  ;;  %s314_s7 = scalar_lea.vmem [#allocation10], %s931_s27  ;;  %s1558_s13 = scalar_lea.vmem [#allocation11], %s931_s27 }
  0x53   : > { %v364_v19 = vsel %vm349_vm1, %v1454_v11, -inf  ;;  %v1468_v20 = vsel %vm340_vm2, 1.0, %v1257_v3  ;;  %v357_v21 = vsel %vm349_vm1, %v345_v13, -inf  ;;  %v352_v24 = vmax.f32 %v350_v14, %v351_v18  ;;  %s739_s11 = sshll.u32 %s314_s7, 4  ;;  %s752_s25 = sshll.u32 %s1558_s13, 4  ;;  %s1568_s11 = int_to_ptr.vmem [resolvable:$true] %s739_s11  ;;  %s1570_s25 = int_to_ptr.vmem [resolvable:$true] %s752_s25 }
  0x54   : > { %v365_v22 = vrot.slane %v364_v19, 4  ;;  %v358_v25 = vrot.slane %v357_v21, 4  ;;  %v371_v26 = vsel %vm349_vm1, %v346_v17, -inf  ;;  %v433_v27 = vrot.slane %v432_v23, 4  ;;  %s721_s24 = scalar_lea.sflag [#allocation6], %s1412_s1  ;;  %s1138_s26 = scalar_lea.vmem %s1568_s11, 128 }
  0x55   : > { %v372_v29 = vrot.slane %v371_v26, 4  ;;  %v439_v30 = vsel %vm349_vm1, %v428_v15, -inf  ;;  %v353_v32 = vrot.slane %v352_v24, 2  ;;  %v447_v38 = vrot.slane %v446_v31, 4  ;;  %p1139_p8 = scmp.ne.s32.totalorder %s1568_s11, %s1138_s26  ;;  %s1259_s10 = smov [#allocation10]  }
  0x56   : > { %v366_v28 = vmax.f32 %v364_v19, %v365_v22  ;;  %v359_v33 = vmax.f32 %v357_v21, %v358_v25  ;;  %v434_v34 = vmax.f32 %v432_v23, %v433_v27  ;;  %v440_v35 = vrot.slane %v439_v30, 4  ;;  %s1142_s8 = sshll.u32 %s1259_s10, 4  ;;  %s1143_s8 = int_to_ptr.vmem [resolvable:$false] %s1142_s8 }
  0x57   : > { %v373_v37 = vmax.f32 %v371_v26, %v372_v29  ;;  %v453_v39 = vsel %vm349_vm1, %v429_v16, -inf  ;;  %v354_v40 = vmax.f32 %v352_v24, %v353_v32  ;;  %v448_v46 = vmax.f32 %v446_v31, %v447_v38  ;;  %p1140_p0 = pnand %p1139_p8, %p1341_p9  ;;  %s1144_s22 = scalar_lea.vmem %s1143_s8, 256 }
  0x58   : > { %v367_v36 = vrot.slane %v366_v28, 2  ;;  %v360_v41 = vrot.slane %v359_v33, 2  ;;  %v435_v42 = vrot.slane %v434_v34, 2  ;;  %v441_v43 = vmax.f32 %v439_v30, %v440_v35  ;;  %v631_v14 = vld [vmem:[#allocation3] sm:$0xf]  ;;  %p1145_p4 = scmp.lt.s32.totalorder %s1568_s11, %s1143_s8  ;;  %p1146_p10 = scmp.lt.s32.totalorder %s1144_s22, %s1138_s26 }
  0x59   : > { %v374_v45 = vrot.slane %v373_v37, 2  ;;  %v454_v47 = vrot.slane %v453_v39, 4  ;;  %v355_v48 = vrot.slane %v354_v40, 1  ;;  %v449_v54 = vrot.slane %v448_v46, 2  ;;  %p1141_p3 = pneg %p1140_p0 }
  0x5a   : > { %v368_v44 = vmax.f32 %v366_v28, %v367_v36  ;;  %v361_v49 = vmax.f32 %v359_v33, %v360_v41  ;;  %v436_v50 = vmax.f32 %v434_v34, %v435_v42  ;;  %v442_v51 = vrot.slane %v441_v43, 2  ;;  %p1147_p13 = por %p1146_p10, %p1145_p4 }
  0x5b   : > { %v375_v53 = vmax.f32 %v373_v37, %v374_v45  ;;  %v455_v55 = vmax.f32 %v453_v39, %v454_v47  ;;  %v356_v56 = vmax.f32 %v354_v40, %v355_v48  ;;  %v450_v62 = vmax.f32 %v448_v46, %v449_v54 }
  0x5c   : > { %v369_v52 = vrot.slane %v368_v44, 1  ;;  %v362_v57 = vrot.slane %v361_v49, 1  ;;  %v437_v58 = vrot.slane %v436_v50, 1  ;;  %v443_v59 = vmax.f32 %v441_v43, %v442_v51  ;;  %p1148_p12 = pnand %p1147_p13, %p1141_p3 }
  0x5d   : > { %v376_v61 = vrot.slane %v375_v53, 1  ;;  %v456_v63 = vrot.slane %v455_v55, 2  ;;  %v575_v13 = vrot.slane %v1468_v20, %v1437_v4  ;;  %v451_v16 = vrot.slane %v450_v62, 1 }
  0x5e   : > { %v370_v60 = vmax.f32 %v368_v44, %v369_v52  ;;  %v363_v0 = vmax.f32 %v361_v49, %v362_v57  ;;  %v438_v3 = vmax.f32 %v436_v50, %v437_v58  ;;  %v444_v12 = vrot.slane %v443_v59, 1 }
  0x5f   : > { %v377_v15 = vmax.f32 %v375_v53, %v376_v61  ;;  %v457_v17 = vmax.f32 %v455_v55, %v456_v63  ;;  %v579_v18 = vrot.slane %v1468_v20, %v1446_v8  ;;  %v583_v22 = vrot.slane %v1468_v20, %v1449_v9 }
  0x60   : > { %v382_v19 = vcombine.low %v356_v56, %v363_v0  ;;  %v445_v21 = vmax.f32 %v443_v59, %v444_v12  ;;  %v587_v23 = vrot.slane %v1468_v20, %v1452_v10  ;;  %v452_v24 = vmax.f32 %v450_v62, %v451_v16 }
  0x61   : > { %v458_v25 = vrot.slane %v457_v17, 1  ;;  %v632_v26 = vadd.f32 %v1468_v20, %v631_v14  ;;  %v383_v29 = vcombine.low %v370_v60, %v377_v15  ;;  %vm659_vm3 = vcmask 1040384  }
  0x62   : > { %v464_v27 = vcombine.low %v438_v3, %v445_v21  ;;  %v386_v30 = vsub.f32 %v1443_v7, %v382_v19 }
  0x63   : > { %v459_v28 = vmax.f32 %v457_v17, %v458_v25  ;;  %633 = vst.msk [vmem:[#allocation3] sm:$0xf] %vm1426_vm0, %v632_v26  ;;  %v387_v35 = vsub.f32 %v1454_v11, %v383_v29 }
  0x64   : > { %v1491_v31 = vsub.f32 %v1439_v5, %v464_v27  ;;  %v388_v36 = vmul.f32 1.442695, %v386_v30 }
  0x65   : > { %v465_v32 = vcombine.low %v452_v24, %v459_v28  ;;  %v390_v38 = vmul.f32 1.442695, %v387_v35 }
  0x66   : > { %v470_v33 = vmul.f32 1.442695, %v1491_v31 }
  0x67   : > { %v1495_v34 = vsub.f32 %v1441_v6, %v465_v32 }
  0x68   : > { %1030 = vpow2.f32 %v470_v33 }
  0x69   : > { %v472_v37 = vmul.f32 1.442695, %v1495_v34 }
  0x6b   : > { %1032 = vpow2.f32 %v472_v37 }
  0x6c   : > { %1034 = vpow2.f32 %v388_v36 }
  0x6d   : > { %1036 = vpow2.f32 %v390_v38 }
  0x75   : > { %v1031_v7 = vpop.eup %1030 }
  0x76   : > { %v476_v39 = vcombine.high %v1031_v7, %v1031_v7  ;;  %v480_v5 = vsel %vm349_vm1, %v1031_v7, 0.0 }
  0x77   : > { %v481_v40 = vrot.slane %v480_v5, 4 }
  0x78   : > { %v1033_v41 = vpop.eup %1032  ;;  %v487_v42 = vsel %vm349_vm1, %v476_v39, 0.0 }
  0x79   : > { %v1501_v6 = vpop.eup %1034  ;;  %v477_v43 = vcombine.high %v1033_v41, %v1033_v41  ;;  %v482_v11 = vadd.f32 %v481_v40, %v480_v5  ;;  %v488_v44 = vrot.slane %v487_v42, 4  ;;  %v494_v45 = vsel %vm349_vm1, %v1033_v41, 0.0 }
  0x7a   : > { %v495_v47 = vrot.slane %v494_v45, 4  ;;  %v394_v48 = vcombine.high %v1501_v6, %v1501_v6  ;;  %v1507_v51 = vpop.eup %1036  ;;  %v398_v54 = vsel %vm349_vm1, %v1501_v6, 0.0 }
  0x7b   : > { %v483_v46 = vrot.slane %v482_v11, 2  ;;  %v489_v49 = vadd.f32 %v488_v44, %v487_v42  ;;  %v501_v50 = vsel %vm349_vm1, %v477_v43, 0.0  ;;  %v395_v59 = vcombine.high %v1507_v51, %v1507_v51 }
  0x7c   : > { %v496_v53 = vadd.f32 %v495_v47, %v494_v45  ;;  %v502_v56 = vrot.slane %v501_v50, 4  ;;  %v405_v60 = vsel %vm349_vm1, %v394_v48, 0.0  ;;  %v399_v63 = vrot.slane %v398_v54, 4 }
  0x7d   : > { %v484_v52 = vadd.f32 %v483_v46, %v482_v11  ;;  %v490_v55 = vrot.slane %v489_v49, 2  ;;  %v412_v12 = vsel %vm349_vm1, %v1507_v51, 0.0  ;;  %v406_v16 = vrot.slane %v405_v60, 4 }
  0x7e   : > { %v497_v58 = vrot.slane %v496_v53, 2  ;;  %v503_v62 = vadd.f32 %v502_v56, %v501_v50  ;;  %v419_v19 = vsel %vm349_vm1, %v395_v59, 0.0  ;;  %v400_v25 = vadd.f32 %v399_v63, %v398_v54 }
  0x7f   : > { %v485_v57 = vrot.slane %v484_v52, 1  ;;  %v491_v61 = vadd.f32 %v490_v55, %v489_v49  ;;  %v413_v26 = vrot.slane %v412_v12, 4  ;;  %v407_v29 = vadd.f32 %v406_v16, %v405_v60 }
  0x80   : > { %v498_v3 = vadd.f32 %v497_v58, %v496_v53  ;;  %v504_v15 = vrot.slane %v503_v62, 2  ;;  %v420_v30 = vrot.slane %v419_v19, 4  ;;  %v401_v33 = vrot.slane %v400_v25, 2 }
  0x81   : > { %v486_v0 = vadd.f32 %v485_v57, %v484_v52  ;;  %v492_v14 = vrot.slane %v491_v61, 1  ;;  %v414_v35 = vadd.f32 %v413_v26, %v412_v12  ;;  %v408_v36 = vrot.slane %v407_v29, 2 }
  0x82   : > { %v499_v17 = vrot.slane %v498_v3, 1  ;;  %v505_v24 = vadd.f32 %v504_v15, %v503_v62  ;;  %v421_v37 = vadd.f32 %v420_v30, %v419_v19  ;;  %v402_v38 = vadd.f32 %v401_v33, %v400_v25 }
  0x83   : > { %1038 = vlog2.f32 %v486_v0  ;;  %v493_v21 = vadd.f32 %v492_v14, %v491_v61  ;;  %v415_v7 = vrot.slane %v414_v35, 2  ;;  %v409_v39 = vadd.f32 %v408_v36, %v407_v29 }
  0x84   : > { %v500_v27 = vadd.f32 %v499_v17, %v498_v3  ;;  %v506_v28 = vrot.slane %v505_v24, 1  ;;  %v422_v5 = vrot.slane %v421_v37, 2  ;;  %v403_v41 = vrot.slane %v402_v38, 1 }
  0x85   : > { %1040 = vlog2.f32 %v493_v21  ;;  %v416_v42 = vadd.f32 %v415_v7, %v414_v35  ;;  %v410_v44 = vrot.slane %v409_v39, 1 }
  0x86   : > { %1042 = vlog2.f32 %v500_v27  ;;  %v507_v32 = vadd.f32 %v506_v28, %v505_v24  ;;  %v423_v45 = vadd.f32 %v422_v5, %v421_v37  ;;  %v404_v48 = vadd.f32 %v403_v41, %v402_v38 }
  0x87   : > { %v417_v49 = vrot.slane %v416_v42, 1  ;;  %v411_v54 = vadd.f32 %v410_v44, %v409_v39  ;;  %v1258_v28 = vmov 1966171168  }
  0x88   : > { %1044 = vlog2.f32 %v507_v32  ;;  %v424_v55 = vrot.slane %v423_v45, 1  ;;  %v603_v29 = vunpack.c.l.s4 %v1258_v28 }
  0x89   : > { %v418_v58 = vadd.f32 %v417_v49, %v416_v42  ;;  %1046 = vrcp.f32 %v404_v48 }
  0x8a   : > { %v425_v61 = vadd.f32 %v424_v55, %v423_v45  ;;  %1048 = vrcp.f32 %v411_v54  ;;  %v604_v5 = vunpack.c.0.s8 %v603_v29 }
  0x8b   : > { %1050 = vrcp.f32 %v418_v58 }
  0x8c   : > { %1052 = vrcp.f32 %v425_v61  ;;  %v562_v61 = vld [vmem:[#allocation2] sm:$0xf] }
  0x90   : > { %v1039_v40 = vpop.eup %1038 }
  0x91   : > { %v509_v43 = vmul.f32 0.6931472, %v1039_v40 }
  0x92   : > { %v1041_v11 = vpop.eup %1040 }
  0x93   : > { %v1043_v46 = vpop.eup %1042  ;;  %v511_v47 = vmul.f32 0.6931472, %v1041_v11 }
  0x94   : > { %v513_v50 = vmul.f32 0.6931472, %v1043_v46 }
  0x95   : > { %v520_v52 = vcombine.low %v509_v43, %v511_v47  ;;  %v1045_v53 = vpop.eup %1044 }
  0x96   : > { %v515_v56 = vmul.f32 0.6931472, %v1045_v53  ;;  %v1047_v35 = vpop.eup %1046  ;;  %v607_v53 = vsub.s32 %v604_v5, %v1430_v2 }
  0x97   : > { %v524_v57 = vsub.f32 %v1491_v31, %v520_v52  ;;  %v1049_v39 = vpop.eup %1048 }
  0x98   : > { %v521_v59 = vcombine.low %v513_v50, %v515_v56  ;;  %v1051_v11 = vpop.eup %1050 }
  0x99   : > { %v526_v60 = vmul.f32 %v1501_v6, %v524_v57  ;;  %v1053_v48 = vpop.eup %1052 }
  0x9a   : > { %v525_v62 = vsub.f32 %v1495_v34, %v521_v59 }
  0x9b   : > { %v530_v63 = vcombine.high %v526_v60, %v526_v60  ;;  %v534_v0 = vsel %vm349_vm1, %v526_v60, 0.0 }
  0x9c   : > { %v535_v3 = vrot.slane %v534_v0, 4  ;;  %v527_v12 = vmul.f32 %v1507_v51, %v525_v62 }
  0x9d   : > { %v541_v14 = vsel %vm349_vm1, %v530_v63, 0.0 }
  0x9e   : > { %v536_v15 = vadd.f32 %v535_v3, %v534_v0  ;;  %v542_v31 = vrot.slane %v541_v14, 4  ;;  %v531_v16 = vcombine.high %v527_v12, %v527_v12  ;;  %v548_v17 = vsel %vm349_vm1, %v527_v12, 0.0 }
  0x9f   : > { %v549_v21 = vrot.slane %v548_v17, 4 }
  0xa0   : > { %v537_v6 = vrot.slane %v536_v15, 2  ;;  %v543_v19 = vadd.f32 %v542_v31, %v541_v14  ;;  %v555_v34 = vsel %vm349_vm1, %v531_v16, 0.0 }
  0xa1   : > { %v550_v26 = vadd.f32 %v549_v21, %v548_v17  ;;  %v556_v27 = vrot.slane %v555_v34, 4 }
  0xa2   : > { %v538_v24 = vadd.f32 %v537_v6, %v536_v15  ;;  %v544_v25 = vrot.slane %v543_v19, 2 }
  0xa3   : > { %v551_v32 = vrot.slane %v550_v26, 2  ;;  %v557_v33 = vadd.f32 %v556_v27, %v555_v34 }
  0xa4   : > { %v539_v51 = vrot.slane %v538_v24, 1  ;;  %v545_v30 = vadd.f32 %v544_v25, %v543_v19 }
  0xa5   : > { %v552_v38 = vadd.f32 %v551_v32, %v550_v26  ;;  %v558_v7 = vrot.slane %v557_v33, 2 }
  0xa6   : > { %v540_v36 = vadd.f32 %v539_v51, %v538_v24  ;;  %v546_v37 = vrot.slane %v545_v30, 1 }
  0xa7   : > { %v553_v41 = vrot.slane %v552_v38, 1  ;;  %v559_v42 = vadd.f32 %v558_v7, %v557_v33 }
  0xa8   : > { %v547_v40 = vadd.f32 %v546_v37, %v545_v30  ;;  %v564_v43 = vmul.f32 %v1047_v35, %v540_v36 }
  0xa9   : > { %v554_v44 = vadd.f32 %v553_v41, %v552_v38  ;;  %v560_v45 = vrot.slane %v559_v42, 1 }
  0xaa   : > { %v566_v46 = vmul.f32 %v1049_v39, %v547_v40  ;;  %v592_v47 = vmul.f32 %v575_v13, %v564_v43 }
  0xab   : > { %v561_v49 = vadd.f32 %v560_v45, %v559_v42  ;;  %v568_v50 = vmul.f32 %v1051_v11, %v554_v44 }
  0xac   : > { %v593_v52 = vmul.f32 %v579_v18, %v566_v46  ;;  %v679_v18 = vld [vmem:[#allocation3] sm:$0xf] }
  0xad   : > { %v570_v54 = vmul.f32 %v1053_v48, %v561_v49  ;;  %v594_v55 = vmul.f32 %v583_v22, %v568_v50  ;;  %v684_v2 = vrot.slane %v679_v18, %v1437_v4  ;;  %v688_v22 = vrot.slane %v679_v18, %v1446_v8 }
  0xae   : > { %v600_v56 = vcombine.low %v592_v47, %v593_v52  ;;  %v692_v0 = vrot.slane %v679_v18, %v1449_v9  ;;  %v696_v31 = vrot.slane %v679_v18, %v1452_v10 }
  0xaf   : > { %v595_v57 = vmul.f32 %v587_v23, %v570_v54  ;;  %v701_v20 = vsel %vm659_vm3, %v684_v2, 0.0  ;;  %v702_v23 = vsel %vm659_vm3, %v688_v22, 0.0 }
  0xb0   : > { %v608_v13 = vrot.slane %v600_v56, %v607_v53  ;;  %v703_v16 = vadd.f32 %v702_v23, %v701_v20  ;;  %v704_v21 = vsel %vm659_vm3, %v692_v0, 0.0 }
  0xb1   : > { %v601_v58 = vcombine.low %v594_v55, %v595_v57 }
  0xb3   : > { %v615_v59 = vrot.slane %v601_v58, %v607_v53 }
  0xb5   : > { %v616_v60 = vcombine.low %v608_v13, %v615_v59 }
  0xb7   : > { %v623_v62 = vrot.slane %v616_v60, %v607_v53 }
  0xb9   : > { %v625_v63 = vadd.f32 %v623_v62, %v562_v61 }
  0xbb   : > { %630 = vst.msk [vmem:[#allocation2] sm:$0xf] %vm1426_vm0, %v625_v63 }
  0xc2   : > { %v637_v3 = vld [vmem:[#allocation2] sm:$0xf] }
  0xc3   : > { %v642_v12 = vrot.slane %v637_v3, %v1437_v4  ;;  %v646_v14 = vrot.slane %v637_v3, %v1446_v8  ;;  %v650_v15 = vrot.slane %v637_v3, %v1449_v9  ;;  %v654_v1 = vrot.slane %v637_v3, %v1452_v10 }
  0xc4   : > { %v705_v8 = vadd.f32 %v704_v21, %v703_v16  ;;  %v706_v9 = vsel %vm659_vm3, %v696_v31, 0.0 }
  0xc5   : > { %v660_v17 = vsel %vm659_vm3, %v642_v12, 0.0  ;;  %v661_v6 = vsel %vm659_vm3, %v646_v14, 0.0  ;;  %v663_v19 = vsel %vm659_vm3, %v650_v15, 0.0  ;;  %v665_v4 = vsel %vm659_vm3, %v654_v1, 0.0 }
  0xc6   : > { %v662_v34 = vadd.f32 %v661_v6, %v660_v17  ;;  %v707_v26 = vadd.f32 %v706_v9, %v705_v8 }
  0xc8   : > { %v664_v24 = vadd.f32 %v663_v19, %v662_v34 }
  0xca   : > { %v666_v25 = vadd.f32 %v665_v4, %v664_v24 }
  0xcc   : > { %667 = vadd.xlane.f32.xlu0 %v666_v25 }
  0xd0   : > { %708 = vadd.xlane.f32.xlu0 %v707_v26 }
 0x155   : > { %v668_v10 = vpop.xlane.xlu0 %667 }
 0x156   : > { %v669_v27 = vrot.slane %v668_v10, 4 }
 0x158   : > { %v670_v28 = vadd.f32 %v669_v27, %v668_v10 }
 0x159   : > { %v709_v29 = vpop.xlane.xlu0 %708 }
 0x15a   : > { %v671_v51 = vrot.slane %v670_v28, 2  ;;  %v710_v30 = vrot.slane %v709_v29, 4 }
 0x15c   : > { %v711_v32 = vadd.f32 %v710_v30, %v709_v29  ;;  %v672_v33 = vadd.f32 %v671_v51, %v670_v28 }
 0x15e   : > { %v712_v35 = vrot.slane %v711_v32, 2  ;;  %v673_v36 = vrot.slane %v672_v33, 1 }
 0x160   : > { %v713_v37 = vadd.f32 %v712_v35, %v711_v32  ;;  %v674_v38 = vadd.f32 %v673_v36, %v672_v33 }
 0x162   : > { %943 = vpush %v674_v38  ;;  %v714_v7 = vrot.slane %v713_v37, 1 }
 0x164   : > { %v715_v39 = vadd.f32 %v714_v7, %v713_v37 }
 0x166   : > { %945 = vpush %v715_v39 }
 0x193   : > { %s944_s14 = spop %943 }
 0x194   : > { %v676_v5 = vstv %s944_s14 }
 0x195   : > { %678 = vst [vmem:[%s314_s7] sm:$0xff] %v676_v5 }
 0x196   : > { %1151 = shalt.err (!%p1148_p12)
}
 0x197   : > { %s1152_s9 = scalar_lea.hbm %s1566_s29, 128  ;;  %s1156_s27 = scalar_lea.hbm %s1642_s3, 256 }
 0x198   : > { %p1153_p5 = scmp.ne.s32.totalorder %s1566_s29, %s1152_s9  ;;  %p1157_p2 = scmp.lt.s32.totalorder %s1566_s29, %s1642_s3 }
 0x199   : > { %p1158_p7 = scmp.lt.s32.totalorder %s1156_s27, %s1152_s9 }
 0x19a   : > { %p1154_p6 = pnand %p1153_p5, %p1341_p9 }
 0x19b   : > { %p1159_p8 = por %p1158_p7, %p1157_p2 }
 0x19c   : > { %p1155_p1 = pneg %p1154_p6 }
 0x19e   : > { %p1160_p0 = pnand %p1159_p8, %p1155_p1 }
 0x1a0   : > { %1163 = shalt.err (!%p1160_p0)
}
 0x1a1   : > { %953 = dma.vmem_to_hbm [thread:$0]  (%p1341_p9), %s1568_s11, 128, %s1566_s29, %s721_s24  }
 0x1a2   : > { %s946_s23 = spop %945  ;;  %s750_s10 = scalar_lea.hbm %s1643_s4, %s936_s6 }
 0x1a3   : > { %v717_v40 = vstv %s946_s23  ;;  %s726_s8 = scalar_lea.sflag [#allocation12], %s1412_s1  ;;  %s1164_s22 = scalar_lea.vmem %s1570_s25, 128 }
 0x1a4   : > { %719 = vst [vmem:[%s1558_s13] sm:$0xff] %v717_v40  ;;  %p1165_p3 = scmp.ne.s32.totalorder %s1570_s25, %s1164_s22  ;;  %s1260_s9 = smov [#allocation11]  }
 0x1a5   : > { %s1168_s5 = sshll.u32 %s1260_s9, 4  ;;  %s1169_s5 = int_to_ptr.vmem [resolvable:$false] %s1168_s5 }
 0x1a6   : > { %p1166_p4 = pnand %p1165_p3, %p1341_p9  ;;  %s1170_s21 = scalar_lea.vmem %s1169_s5, 256 }
 0x1a7   : > { %p1171_p13 = scmp.lt.s32.totalorder %s1570_s25, %s1169_s5  ;;  %p1172_p12 = scmp.lt.s32.totalorder %s1170_s21, %s1164_s22 }
 0x1a8   : > { %p1167_p10 = pneg %p1166_p4 }
 0x1a9   : > { %p1173_p5 = por %p1172_p12, %p1171_p13 }
 0x1ab   : > { %p1174_p6 = pnand %p1173_p5, %p1167_p10 }
 0x1ad   : > { %1177 = shalt.err (!%p1174_p6)
}
 0x1ae   : > { %s1178_s18 = scalar_lea.hbm %s750_s10, 128  ;;  %s1182_s11 = scalar_lea.hbm %s1643_s4, 256 }
 0x1af   : > { %p1179_p1 = scmp.ne.s32.totalorder %s750_s10, %s1178_s18  ;;  %p1183_p8 = scmp.lt.s32.totalorder %s750_s10, %s1643_s4 }
 0x1b0   : > { %p1184_p0 = scmp.lt.s32.totalorder %s1182_s11, %s1178_s18 }
 0x1b1   : > { %p1180_p2 = pnand %p1179_p1, %p1341_p9 }
 0x1b2   : > { %p1185_p3 = por %p1184_p0, %p1183_p8 }
 0x1b3   : > { %p1181_p7 = pneg %p1180_p2 }
 0x1b5   : > { %p1186_p4 = pnand %p1185_p3, %p1181_p7 }
 0x1b7   : > { %1189 = shalt.err (!%p1186_p4)
}
 0x1b8   : > { %954 = dma.vmem_to_hbm [thread:$0]  (%p1341_p9), %s1570_s25, 128, %s750_s10, %s726_s8  }
 0x1b9 PF: > { %s764_s24 = sand.u32 1, %s1232_s15   ;;  %p1657_p10 = scmp.ge.s32.totalorder %s1252_s20, 2 }
 0x1ba   : > { %s765_s27 = scalar_lea.sflag [#allocation6], %s764_s24 }
 0x1bb   : > { %p968_p13 = pnand %p1657_p10, %p1348_p11 }
 0x1bd   : > { %p969_p12 = pneg %p968_p13 }
 0x1bf   : > { %1223 = dma.done.wait (%p969_p12), %s765_s27, 128  }
 0x1c0   : > { %1225 = vsyncadd (%p969_p12), %s765_s27, 4294967168  ;;  %s774_s7 = scalar_lea.sflag [#allocation12], %s764_s24 }
 0x1c1   : > { %1227 = dma.done.wait (%p969_p12), %s774_s7, 128  }
 0x1c2   : > { %1229 = vsyncadd (%p969_p12), %s774_s7, 4294967168  ;;  %s27_s20 = sadd.s32 1, %s1252_s20   ;;  %s1658_s28 = sld [smem:[#allocation18_spill]] }
 0x1c3   : > { %p24_p5 = scmp.ge.s32.totalorder %s27_s20, 4   ;;  %s1659_s25 = sld [smem:[#allocation17_spill]] }
 0x1c4   : > { %s1660_s15 = smov %s1236_s16  ;;  %s1661_s16 = smov %s1240_s17 }
 0x1c5   : > { %s1663_s18 = smov %s1248_s19  ;;  %26 = sbr.rel (!%p24_p5) target bundleno = 12 (0xc), region = 126 }
 0x1c8   : > { %s1662_s17 = smov %s1658_s28 }
 0x1c9   : > { %s1664_s19 = smov %s1659_s25 }
 0x1ca   :  { %779 = vsyncpa [#allocation5], 1 }
 0x1cb   :  { %781 = vsyncpa [#allocation5 + $0x1], 1 }
 0x1cc   :  { %782 = vsyncpa [#allocation8], 1 }
 0x1cd   :  { %784 = vsyncpa [#allocation8 + $0x1], 1 }
 0x1ce   :  { %785 = vsyncpa [#allocation6], 1 }
 0x1cf   :  { %787 = vsyncpa [#allocation6 + $0x1], 1 }
 0x1d0   :  { %788 = vsyncpa [#allocation12], 1 }
 0x1d1   :  { %790 = vsyncpa [#allocation12 + $0x1], 1 }

</bundles_post_ra>
